<compile_context>
chip_gen: v5e
topology: v5e:2x2
jax: 0.10.0
libtpu: 0.0.40
codegen_flags: <defaults>
</compile_context>

<pallas_src>
import functools

import jax
import jax.numpy as jnp
from jax.experimental import pallas as pl
from jax.experimental.pallas import tpu as pltpu


def _round_up(x, m):
    return ((x + m - 1) // m) * m


# ---------------------------------------------------------------------------
# Kernel 1: chem MLP + gate, row-tiled over graph nodes.
#   gated = sigmoid(BN2f(L2f(SiLU(BN1(L1(x)))))) * softplus(BN2c(L2c(...)))
# (L2 / BN2 pre-split into lane-aligned "filter" and "core" halves.)
# ---------------------------------------------------------------------------
def _chem_gate_kernel(x_ref, w1_ref, b1_ref, s1_ref, t1_ref,
                      w2f_ref, b2f_ref, s2f_ref, t2f_ref,
                      w2c_ref, b2c_ref, s2c_ref, t2c_ref,
                      gated_ref):
    x = x_ref[...]
    h = jnp.dot(x, w1_ref[...], preferred_element_type=jnp.float32) + b1_ref[...]
    h = h * s1_ref[...] + t1_ref[...]               # BatchNorm1d (eval, folded)
    h = h * jax.nn.sigmoid(h)                       # SiLU
    filt = jnp.dot(h, w2f_ref[...], preferred_element_type=jnp.float32) + b2f_ref[...]
    filt = filt * s2f_ref[...] + t2f_ref[...]
    core = jnp.dot(h, w2c_ref[...], preferred_element_type=jnp.float32) + b2c_ref[...]
    core = core * s2c_ref[...] + t2c_ref[...]
    gated_ref[...] = jax.nn.sigmoid(filt) * jax.nn.softplus(core)


# ---------------------------------------------------------------------------
# Kernel 2: tiled one-hot scatter-sum (Ng reduction axis) fused with the geom
# MLP and the final feat MLP (concat folded into split w1a/w1b matmuls).
# ---------------------------------------------------------------------------
def _scatter_geom_feat_kernel(ng_total,
                              vids_ref, gated_ref, geom_ref,
                              gw1_ref, gb1_ref, gs1_ref, gt1_ref,
                              gw2_ref, gb2_ref, gs2_ref, gt2_ref,
                              fw1a_ref, fw1b_ref, fb1_ref, fs1_ref, ft1_ref,
                              fw2_ref, fb2_ref, fs2_ref, ft2_ref,
                              o_ref, acc_ref):
    k = pl.program_id(1)
    tms, h_dim = acc_ref.shape
    tkg = gated_ref.shape[0]

    @pl.when(k == 0)
    def _():
        acc_ref[...] = jnp.zeros_like(acc_ref)

    # one-hot [tile_Ns, tile_Ng] built on the fly from the per-tile vids block.
    row0 = pl.program_id(0) * tms
    row_ids = jax.lax.broadcasted_iota(jnp.int32, (tms, tkg), 0) + row0
    vids = vids_ref[...]                                   # [1, tile_Ng] int32
    onehot = (row_ids == vids).astype(jnp.float32)         # exact 0/1

    # Mask gated rows past the true Ng (partial last tile may hold stale VMEM).
    g_rows = jax.lax.broadcasted_iota(jnp.int32, (tkg, h_dim), 0) + k * tkg
    gated = jnp.where(g_rows < ng_total, gated_ref[...], 0.0)

    acc_ref[...] += jnp.dot(onehot, gated, preferred_element_type=jnp.float32)

    @pl.when(k == pl.num_programs(1) - 1)
    def _():
        # geom MLP on this Ns row tile (stays in VMEM, never hits HBM).
        xg = geom_ref[...]
        hg = jnp.dot(xg, gw1_ref[...], preferred_element_type=jnp.float32) + gb1_ref[...]
        hg = hg * gs1_ref[...] + gt1_ref[...]
        hg = hg * jax.nn.sigmoid(hg)
        h_geom = jnp.dot(hg, gw2_ref[...], preferred_element_type=jnp.float32) + gb2_ref[...]
        h_geom = h_geom * gs2_ref[...] + gt2_ref[...]

        # feat MLP with the concat folded into two accumulating matmuls.
        h1 = (jnp.dot(acc_ref[...], fw1a_ref[...], preferred_element_type=jnp.float32)
              + jnp.dot(h_geom, fw1b_ref[...], preferred_element_type=jnp.float32)
              + fb1_ref[...])
        h1 = h1 * fs1_ref[...] + ft1_ref[...]
        h1 = h1 * jax.nn.sigmoid(h1)
        out = jnp.dot(h1, fw2_ref[...], preferred_element_type=jnp.float32) + fb2_ref[...]
        o_ref[...] = out * fs2_ref[...] + ft2_ref[...]


# ---------------------------------------------------------------------------
# Wrappers
# ---------------------------------------------------------------------------
def run_chem_gate(chem_feats, chem_split, h_dim, row_tile=256):
    ng, c = chem_feats.shape
    tm = min(_round_up(ng, 8), row_tile)
    grid = (pl.cdiv(ng, tm),)
    param_specs = [pl.BlockSpec(p.shape, lambda i: (0, 0)) for p in chem_split]
    return pl.pallas_call(
        _chem_gate_kernel,
        out_shape=jax.ShapeDtypeStruct((ng, h_dim), jnp.float32),
        grid=grid,
        in_specs=[pl.BlockSpec((tm, c), lambda i: (i, 0))] + param_specs,
        out_specs=pl.BlockSpec((tm, h_dim), lambda i: (i, 0)),
        compiler_params=pltpu.CompilerParams(dimension_semantics=("parallel",)),
    )(chem_feats, *chem_split)


def run_scatter_geom_feat(gated, nbr_vids, geom_feats, geom_params, feat_split,
                          h_dim, row_tile=256, k_tile=512):
    ns, gdim = geom_feats.shape
    ng = gated.shape[0]
    tms = min(_round_up(ns, 8), row_tile)
    tkg = min(_round_up(ng, 128), k_tile)       # lane-aligned reduction tile
    grid = (pl.cdiv(ns, tms), pl.cdiv(ng, tkg))
    vids2d = nbr_vids.reshape(1, ng).astype(jnp.int32)
    params = tuple(geom_params) + tuple(feat_split)
    param_specs = [pl.BlockSpec(p.shape, lambda i, k: (0, 0)) for p in params]
    kern = functools.partial(_scatter_geom_feat_kernel, ng)
    return pl.pallas_call(
        kern,
        out_shape=jax.ShapeDtypeStruct((ns, h_dim), jnp.float32),
        grid=grid,
        in_specs=[pl.BlockSpec((1, tkg), lambda i, k: (0, k)),      # nbr_vids
                  pl.BlockSpec((tkg, h_dim), lambda i, k: (k, 0)),  # gated h_chem
                  pl.BlockSpec((tms, gdim), lambda i, k: (i, 0)),   # geom feats
                  ] + param_specs,
        out_specs=pl.BlockSpec((tms, h_dim), lambda i, k: (i, 0)),
        scratch_shapes=[pltpu.VMEM((tms, h_dim), jnp.float32)],
        compiler_params=pltpu.CompilerParams(
            dimension_semantics=("parallel", "arbitrary")),
    )(vids2d, gated, geom_feats, *params)


def _split_chem_params(p):
    """(w1,b1,s1,t1,w2,b2,s2,t2) with 2H-wide second layer -> lane-aligned halves."""
    w1, b1, s1, t1, w2, b2, s2, t2 = p
    h = w2.shape[1] // 2
    return (w1, b1, s1, t1,
            w2[:, :h], b2[:, :h], s2[:, :h], t2[:, :h],   # filter half
            w2[:, h:], b2[:, h:], s2[:, h:], t2[:, h:])   # core half


def _split_feat_params(p):
    """Split feat w1 [2H, H] into scatter / geom halves (removes the concat)."""
    w1, b1, s1, t1, w2, b2, s2, t2 = p
    h = w1.shape[0] // 2
    return (w1[:h], w1[h:], b1, s1, t1, w2, b2, s2, t2)


def chem_geom_feat_encoder(chem_feats, geom_feats, nbr_vids,
                           chem_params, geom_params, feat_params,
                           row_tile=256, k_tile=512):
    """Returns (surface.x, graph.x) for the use_neigh=True eval-mode forward."""
    h_dim = geom_params[4].shape[1]
    chem_split = _split_chem_params(chem_params)
    feat_split = _split_feat_params(feat_params)
    h_chem = run_chem_gate(chem_feats, chem_split, h_dim, row_tile)      # [Ng, H]
    h_geom_out = run_scatter_geom_feat(h_chem, nbr_vids, geom_feats,
                                       geom_params, feat_split, h_dim,
                                       row_tile, k_tile)                 # [Ns, H]
    return h_geom_out, h_chem


# ---------------------------------------------------------------------------
# Parameter construction (deterministic, synthetic; BN folded to affine)
# ---------------------------------------------------------------------------
def _fold_bn(gamma, beta, mean, var, eps=1e-5):
    scale = gamma / jnp.sqrt(var + eps)
    shift = beta - mean * scale
    return scale.reshape(1, -1), shift.reshape(1, -1)


def make_mlp_params(key, d_in, d_hidden, d_out):
    ks = jax.random.split(key, 12)
    w1 = jax.random.normal(ks[0], (d_in, d_hidden), jnp.float32) * 0.1
    b1 = jax.random.normal(ks[1], (1, d_hidden), jnp.float32) * 0.05
    w2 = jax.random.normal(ks[2], (d_hidden, d_out), jnp.float32) * 0.1
    b2 = jax.random.normal(ks[3], (1, d_out), jnp.float32) * 0.05
    g1 = 1.0 + 0.1 * jax.random.normal(ks[4], (d_hidden,), jnp.float32)
    be1 = 0.1 * jax.random.normal(ks[5], (d_hidden,), jnp.float32)
    m1 = 0.1 * jax.random.normal(ks[6], (d_hidden,), jnp.float32)
    v1 = jnp.abs(1.0 + 0.1 * jax.random.normal(ks[7], (d_hidden,), jnp.float32))
    g2 = 1.0 + 0.1 * jax.random.normal(ks[8], (d_out,), jnp.float32)
    be2 = 0.1 * jax.random.normal(ks[9], (d_out,), jnp.float32)
    m2 = 0.1 * jax.random.normal(ks[10], (d_out,), jnp.float32)
    v2 = jnp.abs(1.0 + 0.1 * jax.random.normal(ks[11], (d_out,), jnp.float32))
    s1, t1 = _fold_bn(g1, be1, m1, v1)
    s2, t2 = _fold_bn(g2, be2, m2, v2)
    return (w1, b1, s1, t1, w2, b2, s2, t2)


# ---------------------------------------------------------------------------
# Pure-JAX reference (for verification)
# ---------------------------------------------------------------------------
def _ref_mlp(x, p):
    w1, b1, s1, t1, w2, b2, s2, t2 = p
    h = (x @ w1 + b1) * s1 + t1
    h = h * jax.nn.sigmoid(h)
    return (h @ w2 + b2) * s2 + t2


def _ref_forward(chem_feats, geom_feats, nbr_vids, cp, gp, fp):
    h_geom = _ref_mlp(geom_feats, gp)
    h_chem = _ref_mlp(chem_feats, cp)
    h = h_chem.shape[1] // 2
    filt, core = h_chem[:, :h], h_chem[:, h:]
    gated = jax.nn.sigmoid(filt) * jax.nn.softplus(core)
    scat = jax.ops.segment_sum(gated, nbr_vids, num_segments=geom_feats.shape[0])
    h_geom_out = _ref_mlp(jnp.concatenate([scat, h_geom], -1), fp)
    return h_geom_out, gated


# ---------------------------------------------------------------------------
if __name__ == "__main__":
    # hparams: h_dim=32, graph_feat_dim=20, surface_feat_dim=12, use_neigh=True
    H_DIM = 32
    CHEM_DIM = 20
    GEOM_DIM = 12
    NG = 200    # number of graph nodes
    NS = 48     # number of surface vertices

    key = jax.random.PRNGKey(0)
    k_chem, k_geom, k_vids, k_p1, k_p2, k_p3 = jax.random.split(key, 6)

    chem_feats = jax.random.normal(k_chem, (NG, CHEM_DIM), jnp.float32)
    geom_feats = jax.random.normal(k_geom, (NS, GEOM_DIM), jnp.float32)
    nbr_vids = jax.random.randint(k_vids, (NG,), 0, NS, dtype=jnp.int32)

    chem_params = make_mlp_params(k_p1, CHEM_DIM, H_DIM, 2 * H_DIM)
    geom_params = make_mlp_params(k_p2, GEOM_DIM, H_DIM, H_DIM)
    feat_params = make_mlp_params(k_p3, 2 * H_DIM, H_DIM, H_DIM)

    # Small tiles here so the test exercises multi-tile grids (row + reduction);
    # production defaults are row_tile=256, k_tile=512.
    surface_x, graph_x = chem_geom_feat_encoder(
        chem_feats, geom_feats, nbr_vids,
        chem_params, geom_params, feat_params,
        row_tile=64, k_tile=128)
    jax.block_until_ready((surface_x, graph_x))

    ref_surface_x, ref_graph_x = _ref_forward(
        chem_feats, geom_feats, nbr_vids, chem_params, geom_params, feat_params)

    assert surface_x.shape == (NS, H_DIM) and graph_x.shape == (NG, H_DIM)
    assert jnp.allclose(surface_x, ref_surface_x, atol=1e-3, rtol=1e-3)
    assert jnp.allclose(graph_x, ref_graph_x, atol=1e-3, rtol=1e-3)

    print("KERNEL_OK")
</pallas_src>

<mosaic_0001>
module attributes {stable_mosaic.version = 11 : i64} {
  func.func @_chem_gate_kernel(%arg0: i32, %arg1: memref<64x20xf32, #tpu.memory_space<vmem>>, %arg2: memref<20x32xf32, #tpu.memory_space<vmem>>, %arg3: memref<1x32xf32, #tpu.memory_space<vmem>>, %arg4: memref<1x32xf32, #tpu.memory_space<vmem>>, %arg5: memref<1x32xf32, #tpu.memory_space<vmem>>, %arg6: memref<32x32xf32, #tpu.memory_space<vmem>>, %arg7: memref<1x32xf32, #tpu.memory_space<vmem>>, %arg8: memref<1x32xf32, #tpu.memory_space<vmem>>, %arg9: memref<1x32xf32, #tpu.memory_space<vmem>>, %arg10: memref<32x32xf32, #tpu.memory_space<vmem>>, %arg11: memref<1x32xf32, #tpu.memory_space<vmem>>, %arg12: memref<1x32xf32, #tpu.memory_space<vmem>>, %arg13: memref<1x32xf32, #tpu.memory_space<vmem>>, %arg14: memref<64x32xf32, #tpu.memory_space<vmem>>) attributes {dimension_semantics = [#tpu.dimension_semantics<parallel>], iteration_bounds = array<i64: 4>, scalar_prefetch = 0 : i64, scratch_operands = 0 : i64, tpu.core_type = #tpu.core_type<tc>, window_params = [{transform_indices = @transform_0, window_bounds = array<i64: 64, 20>}, {pipeline_mode = #tpu.pipeline_mode<synchronous>, transform_indices = @transform_1, window_bounds = array<i64: 20, 32>}, {pipeline_mode = #tpu.pipeline_mode<synchronous>, transform_indices = @transform_2, window_bounds = array<i64: 1, 32>}, {pipeline_mode = #tpu.pipeline_mode<synchronous>, transform_indices = @transform_3, window_bounds = array<i64: 1, 32>}, {pipeline_mode = #tpu.pipeline_mode<synchronous>, transform_indices = @transform_4, window_bounds = array<i64: 1, 32>}, {pipeline_mode = #tpu.pipeline_mode<synchronous>, transform_indices = @transform_5, window_bounds = array<i64: 32, 32>}, {pipeline_mode = #tpu.pipeline_mode<synchronous>, transform_indices = @transform_6, window_bounds = array<i64: 1, 32>}, {pipeline_mode = #tpu.pipeline_mode<synchronous>, transform_indices = @transform_7, window_bounds = array<i64: 1, 32>}, {pipeline_mode = #tpu.pipeline_mode<synchronous>, transform_indices = @transform_8, window_bounds = array<i64: 1, 32>}, {pipeline_mode = #tpu.pipeline_mode<synchronous>, transform_indices = @transform_9, window_bounds = array<i64: 32, 32>}, {pipeline_mode = #tpu.pipeline_mode<synchronous>, transform_indices = @transform_10, window_bounds = array<i64: 1, 32>}, {pipeline_mode = #tpu.pipeline_mode<synchronous>, transform_indices = @transform_11, window_bounds = array<i64: 1, 32>}, {pipeline_mode = #tpu.pipeline_mode<synchronous>, transform_indices = @transform_12, window_bounds = array<i64: 1, 32>}, {transform_indices = @transform_13, window_bounds = array<i64: 64, 32>}]} {
    %c0 = arith.constant 0 : index
    %c0_0 = arith.constant 0 : index
    %0 = vector.load %arg1[%c0, %c0_0] : memref<64x20xf32, #tpu.memory_space<vmem>>, vector<64x20xf32>
    %c0_1 = arith.constant 0 : index
    %c0_2 = arith.constant 0 : index
    %1 = vector.load %arg2[%c0_1, %c0_2] : memref<20x32xf32, #tpu.memory_space<vmem>>, vector<20x32xf32>
    %cst = arith.constant dense<0.000000e+00> : vector<64x32xf32>
    %2 = tpu.matmul %0, %1, %cst {dimension_numbers = #tpu.dot_dimension_numbers<[1], [0], [0], [1], [0, 0, 1, 1], [], []>} : vector<64x20xf32>, vector<20x32xf32>, vector<64x32xf32> -> vector<64x32xf32>
    %c0_3 = arith.constant 0 : index
    %c0_4 = arith.constant 0 : index
    %3 = vector.load %arg3[%c0_3, %c0_4] : memref<1x32xf32, #tpu.memory_space<vmem>>, vector<1x32xf32>
    %4 = vector.broadcast %3 : vector<1x32xf32> to vector<64x32xf32>
    %5 = arith.addf %2, %4 : vector<64x32xf32>
    %c0_5 = arith.constant 0 : index
    %c0_6 = arith.constant 0 : index
    %6 = vector.load %arg4[%c0_5, %c0_6] : memref<1x32xf32, #tpu.memory_space<vmem>>, vector<1x32xf32>
    %7 = vector.broadcast %6 : vector<1x32xf32> to vector<64x32xf32>
    %8 = arith.mulf %5, %7 : vector<64x32xf32>
    %c0_7 = arith.constant 0 : index
    %c0_8 = arith.constant 0 : index
    %9 = vector.load %arg5[%c0_7, %c0_8] : memref<1x32xf32, #tpu.memory_space<vmem>>, vector<1x32xf32>
    %10 = vector.broadcast %9 : vector<1x32xf32> to vector<64x32xf32>
    %11 = arith.addf %8, %10 : vector<64x32xf32>
    %12 = arith.negf %11 : vector<64x32xf32>
    %13 = math.exp %12 : vector<64x32xf32>
    %cst_9 = arith.constant 1.000000e+00 : f32
    %14 = vector.broadcast %cst_9 : f32 to vector<64x32xf32>
    %15 = arith.addf %14, %13 : vector<64x32xf32>
    %16 = arith.divf %14, %15 : vector<64x32xf32>
    %17 = arith.mulf %11, %16 : vector<64x32xf32>
    %c0_10 = arith.constant 0 : index
    %c0_11 = arith.constant 0 : index
    %18 = vector.load %arg6[%c0_10, %c0_11] : memref<32x32xf32, #tpu.memory_space<vmem>>, vector<32x32xf32>
    %cst_12 = arith.constant dense<0.000000e+00> : vector<64x32xf32>
    %19 = tpu.matmul %17, %18, %cst_12 {dimension_numbers = #tpu.dot_dimension_numbers<[1], [0], [0], [1], [0, 0, 1, 1], [], []>} : vector<64x32xf32>, vector<32x32xf32>, vector<64x32xf32> -> vector<64x32xf32>
    %c0_13 = arith.constant 0 : index
    %c0_14 = arith.constant 0 : index
    %20 = vector.load %arg7[%c0_13, %c0_14] : memref<1x32xf32, #tpu.memory_space<vmem>>, vector<1x32xf32>
    %21 = vector.broadcast %20 : vector<1x32xf32> to vector<64x32xf32>
    %22 = arith.addf %19, %21 : vector<64x32xf32>
    %c0_15 = arith.constant 0 : index
    %c0_16 = arith.constant 0 : index
    %23 = vector.load %arg8[%c0_15, %c0_16] : memref<1x32xf32, #tpu.memory_space<vmem>>, vector<1x32xf32>
    %24 = vector.broadcast %23 : vector<1x32xf32> to vector<64x32xf32>
    %25 = arith.mulf %22, %24 : vector<64x32xf32>
    %c0_17 = arith.constant 0 : index
    %c0_18 = arith.constant 0 : index
    %26 = vector.load %arg9[%c0_17, %c0_18] : memref<1x32xf32, #tpu.memory_space<vmem>>, vector<1x32xf32>
    %27 = vector.broadcast %26 : vector<1x32xf32> to vector<64x32xf32>
    %28 = arith.addf %25, %27 : vector<64x32xf32>
    %c0_19 = arith.constant 0 : index
    %c0_20 = arith.constant 0 : index
    %29 = vector.load %arg10[%c0_19, %c0_20] : memref<32x32xf32, #tpu.memory_space<vmem>>, vector<32x32xf32>
    %cst_21 = arith.constant dense<0.000000e+00> : vector<64x32xf32>
    %30 = tpu.matmul %17, %29, %cst_21 {dimension_numbers = #tpu.dot_dimension_numbers<[1], [0], [0], [1], [0, 0, 1, 1], [], []>} : vector<64x32xf32>, vector<32x32xf32>, vector<64x32xf32> -> vector<64x32xf32>
    %c0_22 = arith.constant 0 : index
    %c0_23 = arith.constant 0 : index
    %31 = vector.load %arg11[%c0_22, %c0_23] : memref<1x32xf32, #tpu.memory_space<vmem>>, vector<1x32xf32>
    %32 = vector.broadcast %31 : vector<1x32xf32> to vector<64x32xf32>
    %33 = arith.addf %30, %32 : vector<64x32xf32>
    %c0_24 = arith.constant 0 : index
    %c0_25 = arith.constant 0 : index
    %34 = vector.load %arg12[%c0_24, %c0_25] : memref<1x32xf32, #tpu.memory_space<vmem>>, vector<1x32xf32>
    %35 = vector.broadcast %34 : vector<1x32xf32> to vector<64x32xf32>
    %36 = arith.mulf %33, %35 : vector<64x32xf32>
    %c0_26 = arith.constant 0 : index
    %c0_27 = arith.constant 0 : index
    %37 = vector.load %arg13[%c0_26, %c0_27] : memref<1x32xf32, #tpu.memory_space<vmem>>, vector<1x32xf32>
    %38 = vector.broadcast %37 : vector<1x32xf32> to vector<64x32xf32>
    %39 = arith.addf %36, %38 : vector<64x32xf32>
    %40 = arith.negf %28 : vector<64x32xf32>
    %41 = math.exp %40 : vector<64x32xf32>
    %cst_28 = arith.constant 1.000000e+00 : f32
    %42 = vector.broadcast %cst_28 : f32 to vector<64x32xf32>
    %43 = arith.addf %42, %41 : vector<64x32xf32>
    %44 = arith.divf %42, %43 : vector<64x32xf32>
    %cst_29 = arith.constant 0.000000e+00 : f32
    %45 = vector.broadcast %cst_29 : f32 to vector<64x32xf32>
    %46 = arith.maximumf %39, %45 : vector<64x32xf32>
    %47 = vector.broadcast %cst_29 : f32 to vector<64x32xf32>
    %48 = arith.subf %39, %47 : vector<64x32xf32>
    %49 = arith.cmpf one, %48, %48 : vector<64x32xf32>
    %50 = vector.broadcast %cst_29 : f32 to vector<64x32xf32>
    %51 = arith.addf %39, %50 : vector<64x32xf32>
    %52 = math.absf %48 : vector<64x32xf32>
    %cst_30 = arith.constant 0.000000e+00 : f32
    %53 = vector.broadcast %cst_30 : f32 to vector<64x32xf32>
    %54 = arith.subf %53, %52 : vector<64x32xf32>
    %55 = math.exp %54 : vector<64x32xf32>
    %56 = math.log1p %55 : vector<64x32xf32>
    %57 = arith.addf %46, %56 : vector<64x32xf32>
    %58 = arith.select %49, %51, %57 : vector<64x32xi1>, vector<64x32xf32>
    %59 = arith.mulf %44, %58 : vector<64x32xf32>
    %c0_31 = arith.constant 0 : index
    %c0_32 = arith.constant 0 : index
    %60 = vector.load %arg14[%c0_31, %c0_32] : memref<64x32xf32, #tpu.memory_space<vmem>>, vector<64x32xf32>
    tpu.vector_store %arg14[%c0_31, %c0_32], %59 {strides = array<i32>} : memref<64x32xf32, #tpu.memory_space<vmem>>, vector<64x32xf32>,
    return
  }
  func.func @transform_0(%arg0: i32) -> (i32, i32) {
    %c0_i32 = arith.constant 0 : i32
    %c0_i32_0 = arith.constant 0 : i32
    return %arg0, %c0_i32 : i32, i32
  }
  func.func @transform_1(%arg0: i32) -> (i32, i32) {
    %c0_i32 = arith.constant 0 : i32
    %c0_i32_0 = arith.constant 0 : i32
    %c0_i32_1 = arith.constant 0 : i32
    return %c0_i32, %c0_i32_0 : i32, i32
  }
  func.func @transform_2(%arg0: i32) -> (i32, i32) {
    %c0_i32 = arith.constant 0 : i32
    %c0_i32_0 = arith.constant 0 : i32
    %c0_i32_1 = arith.constant 0 : i32
    return %c0_i32, %c0_i32_0 : i32, i32
  }
  func.func @transform_3(%arg0: i32) -> (i32, i32) {
    %c0_i32 = arith.constant 0 : i32
    %c0_i32_0 = arith.constant 0 : i32
    %c0_i32_1 = arith.constant 0 : i32
    return %c0_i32, %c0_i32_0 : i32, i32
  }
  func.func @transform_4(%arg0: i32) -> (i32, i32) {
    %c0_i32 = arith.constant 0 : i32
    %c0_i32_0 = arith.constant 0 : i32
    %c0_i32_1 = arith.constant 0 : i32
    return %c0_i32, %c0_i32_0 : i32, i32
  }
  func.func @transform_5(%arg0: i32) -> (i32, i32) {
    %c0_i32 = arith.constant 0 : i32
    %c0_i32_0 = arith.constant 0 : i32
    %c0_i32_1 = arith.constant 0 : i32
    return %c0_i32, %c0_i32_0 : i32, i32
  }
  func.func @transform_6(%arg0: i32) -> (i32, i32) {
    %c0_i32 = arith.constant 0 : i32
    %c0_i32_0 = arith.constant 0 : i32
    %c0_i32_1 = arith.constant 0 : i32
    return %c0_i32, %c0_i32_0 : i32, i32
  }
  func.func @transform_7(%arg0: i32) -> (i32, i32) {
    %c0_i32 = arith.constant 0 : i32
    %c0_i32_0 = arith.constant 0 : i32
    %c0_i32_1 = arith.constant 0 : i32
    return %c0_i32, %c0_i32_0 : i32, i32
  }
  func.func @transform_8(%arg0: i32) -> (i32, i32) {
    %c0_i32 = arith.constant 0 : i32
    %c0_i32_0 = arith.constant 0 : i32
    %c0_i32_1 = arith.constant 0 : i32
    return %c0_i32, %c0_i32_0 : i32, i32
  }
  func.func @transform_9(%arg0: i32) -> (i32, i32) {
    %c0_i32 = arith.constant 0 : i32
    %c0_i32_0 = arith.constant 0 : i32
    %c0_i32_1 = arith.constant 0 : i32
    return %c0_i32, %c0_i32_0 : i32, i32
  }
  func.func @transform_10(%arg0: i32) -> (i32, i32) {
    %c0_i32 = arith.constant 0 : i32
    %c0_i32_0 = arith.constant 0 : i32
    %c0_i32_1 = arith.constant 0 : i32
    return %c0_i32, %c0_i32_0 : i32, i32
  }
  func.func @transform_11(%arg0: i32) -> (i32, i32) {
    %c0_i32 = arith.constant 0 : i32
    %c0_i32_0 = arith.constant 0 : i32
    %c0_i32_1 = arith.constant 0 : i32
    return %c0_i32, %c0_i32_0 : i32, i32
  }
  func.func @transform_12(%arg0: i32) -> (i32, i32) {
    %c0_i32 = arith.constant 0 : i32
    %c0_i32_0 = arith.constant 0 : i32
    %c0_i32_1 = arith.constant 0 : i32
    return %c0_i32, %c0_i32_0 : i32, i32
  }
  func.func @transform_13(%arg0: i32) -> (i32, i32) {
    %c0_i32 = arith.constant 0 : i32
    %c0_i32_0 = arith.constant 0 : i32
    return %arg0, %c0_i32 : i32, i32
  }
}

</mosaic_0001>

<bundles_post_ra>
// kernel: tpu_custom_call.1
= control target key start
LH: loop header
LB: loop body
LE: loop exit
PB: predicated region body
PF: predicated region fallthrough
CT: control target
= control target key end

     0   :  { %s2419_s0 = inlined_call_operand.vmem [shape: f32[200,20], index: 0, kind: input, shape index: {}]   ;;  %s2420_s1 = inlined_call_operand.vmem [shape: f32[20,32], index: 1, kind: input, shape index: {}]   ;;  %s2421_s2 = inlined_call_operand.vmem [shape: f32[1,32], index: 2, kind: input, shape index: {}]   ;;  %s2422_s3 = inlined_call_operand.vmem [shape: f32[1,32], index: 3, kind: input, shape index: {}]   ;;  %s2423_s4 = inlined_call_operand.vmem [shape: f32[1,32], index: 4, kind: input, shape index: {}]   ;;  %s2424_s5 = inlined_call_operand.vmem [shape: f32[32,32], index: 5, kind: input, shape index: {}]   ;;  %s2425_s6 = inlined_call_operand.vmem [shape: f32[1,32], index: 6, kind: input, shape index: {}]   ;;  %s2426_s7 = inlined_call_operand.vmem [shape: f32[1,32], index: 7, kind: input, shape index: {}]   ;;  %s2427_s8 = inlined_call_operand.vmem [shape: f32[1,32], index: 8, kind: input, shape index: {}]   ;;  %s2428_s9 = inlined_call_operand.vmem [shape: f32[32,32], index: 9, kind: input, shape index: {}]   ;;  %s2429_s10 = inlined_call_operand.vmem [shape: f32[1,32], index: 10, kind: input, shape index: {}]   ;;  %s2430_s11 = inlined_call_operand.vmem [shape: f32[1,32], index: 11, kind: input, shape index: {}]   ;;  %s2431_s12 = inlined_call_operand.vmem [shape: f32[1,32], index: 12, kind: input, shape index: {}]   ;;  %s2432_s13 = inlined_call_operand.vmem [shape: f32[200,32], index: 13, kind: output, shape index: {}]  }
   0x1   :  { %2433 = sst [smem:[#allocation3_spill]] %s2419_s0 }
   0x2   :  { %2434 = sst [smem:[#allocation4_spill]] %s2420_s1 }
   0x3   :  { %s1888_s25 = smov 0   ;;  %s1890_s26 = smov 0  }
   0x4   :  { %s1892_s27 = smov 0  }
   0x5 LB: > { %s1901_s28 = sadd.s32 4294967295, %s1784_s27   ;;  %s1903_s29 = sadd.s32 1, %s1784_s27   ;;  %s1784_s27 = sphi %s1892_s27, %s2464_s27   ;;  %s1780_s26 = sphi %s1890_s26, %s2463_s26   ;;  %s1776_s25 = sphi %s1888_s25, %s2462_s25  }
   0x6   : > { %s305_s30 = ssub.s32 %s1784_s27, %s1903_s29  ;;  %s308_s14 = sadd.s32 1, %s1780_s26 }
   0x7   : > { %p306_p0 = scmp.eq.s32.totalorder %s305_s30, 0  ;;  %p318_p1 = scmp.ne.s32.totalorder %s1780_s26, %s1776_s25 }
   0x8   : > { %p319_p2 = scmp.eq.s32.totalorder %s1901_s28, 3  ;;  %p1461_p3 = scmp.ge.s32.totalorder %s1784_s27, 1 }
   0x9   : > { %s1911_s15 = scalar_select %p306_p0, %s1780_s26, %s308_s14  }
   0xa   : > { %p1913_p4 = por %p319_p2, %p318_p1  ;;  %p396_p5 = scmp.lt.s32.totalorder %s1784_s27, 5 }
   0xc   : > { %p397_p6 = pnand %p1461_p3, %p396_p5 }
   0xd   : > { %s2436_s1 = sld [smem:[#allocation4_spill]] (!%p397_p6)  ;;  %s1924_s21 = sshll.u32 (!%p397_p6), %s1901_s28, 3 }
   0xe   : > { %400 = sbr.rel (%p397_p6) target bundleno = 470 (0x1d6), region = 72  ;;  %p448_p7 = scmp.lt.s32.totalorder (!%p397_p6), %s1924_s21, 24 }
   0xf   : > { %s2437_s0 = sld [smem:[#allocation3_spill]] (!%p397_p6)  ;;  %s440_s23 = sand.u32 (!%p397_p6), 1, %s1776_s25  }
  0x10   : > { %s1462_s25 = sshll.u32 (!%p397_p6), %s440_s23, 6 }
  0x13   : > { %v472_v0 = vld [vmem:[%s2436_s1 + $0x10] sm:$0xf]  ;;  %vm502_vm0 = vcmask 1043456   ;;  %v471_v1 = vld [vmem:[%s2436_s1 + $0x8] sm:$0xff]  ;;  %v470_v2 = vld [vmem:[%s2436_s1] sm:$0xff]  ;;  %s449_s24 = scalar_select %p448_p7, %s1924_s21, 24 }
  0x14   : > { %1465 = vmatpush.msk.msra.mxu0 %vm502_vm0, %v472_v0  ;;  %1526 = vmatpush.msk.msra.mxu3 %vm502_vm0, %v472_v0  ;;  %vm477_vm1 = vcmask 162816   ;;  %v1945_v11 = vld [vmem:[%s2421_s2] ss:$0 sm:$0xff]  ;;  %v734_v12 = vld [vmem:[%s2424_s5 + $0x18] sm:$0xff]  ;;  %v733_v15 = vld [vmem:[%s2424_s5 + $0x10] sm:$0xff]  ;;  %vm739_vm6 = vcmask 261120  }
  0x15   : > { %s1464_s27 = sshll.u32 %s449_s24, 3  ;;  %v832_v13 = vld [vmem:[%s2428_s9 + $0x18] sm:$0xff]  ;;  %776 = vmatpush.msra.mxu1 %v734_v12  ;;  %v1956_v14 = vld [vmem:[%s2422_s3] ss:$0 sm:$0xff]  ;;  %v831_v16 = vld [vmem:[%s2428_s9 + $0x10] sm:$0xff]  ;;  %s2164_s24 = scalar_lea.vmem [#allocation2], %s1462_s25  }
  0x16   : > { %520 = vmatpush.msra.mxu0 %v471_v1  ;;  %1527 = vmatpush.msra.mxu3 %v471_v1  ;;  %s451_s17 = scalar_lea.vmem %s2437_s0, %s1464_s27  ;;  %v1968_v19 = vld [vmem:[%s2423_s4] ss:$0 sm:$0xff]  ;;  %v732_v20 = vld [vmem:[%s2424_s5 + $0x8] sm:$0xff]  ;;  %s1222_s27 = ssub.s32 (%p1913_p4), 25, %s1924_s21 }
  0x17   : > { %v462_v3 = vld [vmem:[%s451_s17] sm:$0xff]  ;;  %v469_v4 = vld [vmem:[%s451_s17 + $0x38] sm:$0xff]  ;;  %v463_v5 = vld [vmem:[%s451_s17 + $0x8] sm:$0xff]  ;;  %849 = vmatpush.msra.mxu2 %v832_v13  ;;  %777 = vmatpush.msra.mxu1 %v733_v15  ;;  %s1523_s30 = sshll.u32 (%p1913_p4), %s1901_s28, 6  ;;  %p1223_p8 = scmp.lt.s32.totalorder (%p1913_p4), %s1222_s27, 8 }
  0x18   : > { %521 = vmatpush.msra.mxu0 %v470_v2  ;;  %1528 = vmatpush.msra.mxu3 %v470_v2  ;;  %v464_v6 = vld [vmem:[%s451_s17 + $0x10] sm:$0xff]  ;;  %v465_v7 = vld [vmem:[%s451_s17 + $0x18] sm:$0xff]  ;;  %v466_v8 = vld [vmem:[%s451_s17 + $0x20] sm:$0xff]  ;;  %s2365_s18 = scalar_lea.vmem (%p1913_p4), %s2432_s13, %s1523_s30  }
  0x19   : > { %1466 = vmatmul.msk.f32.vlgmr.msra.gmra.mxu0 %vm477_vm1, %v462_v3  ;;  %1473 = vmatmul.msk.f32.vlgmr.msra.gmra.mxu3 %vm477_vm1, %v469_v4  ;;  %v467_v9 = vld [vmem:[%s451_s17 + $0x28] sm:$0xff]  ;;  %v468_v10 = vld [vmem:[%s451_s17 + $0x30] sm:$0xff]  ;;  %v731_v23 = vld [vmem:[%s2424_s5] sm:$0xff] }
  0x1a   : > { %1529 = vmatpush.msrb.mxu3 %v734_v12  ;;  %850 = vmatpush.msra.mxu2 %v831_v16  ;;  %v830_v21 = vld [vmem:[%s2428_s9 + $0x8] sm:$0xff]  ;;  %v829_v24 = vld [vmem:[%s2428_s9] sm:$0xff] }
  0x1b   : > { %778 = vmatpush.msra.mxu1 %v732_v20 }
  0x1c   : > { %1530 = vmatpush.msrb.mxu3 %v733_v15  ;;  %851 = vmatpush.msra.mxu2 %v830_v21 }
  0x1d   : > { %779 = vmatpush.msra.mxu1 %v731_v23 }
  0x1e   : > { %1531 = vmatpush.msrb.mxu3 %v732_v20  ;;  %852 = vmatpush.msra.mxu2 %v829_v24 }
  0x20   : > { %1532 = vmatpush.msrb.mxu3 %v731_v23 }
  0x21   : > { %1467 = vmatmul.msk.f32.gmra.mxu0 %vm477_vm1, %v463_v5 }
  0x22   : > { %1533 = vmatpush.msra.mxu3 %v832_v13 }
  0x24   : > { %1534 = vmatpush.msra.mxu3 %v831_v16 }
  0x26   : > { %1535 = vmatpush.msra.mxu3 %v830_v21 }
  0x28   : > { %1536 = vmatpush.msra.mxu3 %v829_v24 }
  0x29   : > { %1468 = vmatmul.msk.f32.gmra.mxu0 %vm477_vm1, %v464_v6 }
  0x31   : > { %1469 = vmatmul.msk.f32.gmra.mxu0 %vm477_vm1, %v465_v7 }
  0x39   : > { %1470 = vmatmul.msk.f32.gmra.mxu0 %vm477_vm1, %v466_v8 }
  0x41   : > { %1471 = vmatmul.msk.f32.gmra.mxu0 %vm477_vm1, %v467_v9 }
  0x49   : > { %1472 = vmatmul.msk.f32.gmra.mxu0 %vm477_vm1, %v468_v10 }
  0x96   : > { %v523_v17 = vpop.f32.mrf.mxu0 }
  0x97   : > { %v524_v18 = vadd.f32 %v1945_v11, %v523_v17 }
  0x99   : > { %v551_v22 = vmul.f32 %v1956_v14, %v524_v18 }
  0x9b   : > { %v563_v25 = vadd.f32 %v1968_v19, %v551_v22 }
  0x9c   : > { %v544_v47 = vpop.f32.mrf.mxu3 }
  0x9d   : > { %v1474_v26 = vmul.f32 -1.442695, %v563_v25  ;;  %v545_v54 = vadd.f32 %v1945_v11, %v544_v47 }
  0x9e   : > { %v526_v27 = vpop.f32.mrf.mxu0 }
  0x9f   : > { %1634 = vpow2.f32 %v1474_v26  ;;  %v527_v28 = vadd.f32 %v1945_v11, %v526_v27  ;;  %v558_v0 = vmul.f32 %v1956_v14, %v545_v54 }
  0xa1   : > { %v552_v29 = vmul.f32 %v1956_v14, %v527_v28  ;;  %v2012_v9 = vadd.f32 %v1968_v19, %v558_v0 }
  0xa3   : > { %v1987_v30 = vadd.f32 %v1968_v19, %v552_v29  ;;  %v1481_v23 = vmul.f32 -1.442695, %v2012_v9 }
  0xa5   : > { %v1635_v31 = vpop.eup %1634  ;;  %v1475_v32 = vmul.f32 -1.442695, %v1987_v30 }
  0xa6   : > { %v595_v33 = vadd.f32 1.0, %v1635_v31  ;;  %v529_v34 = vpop.f32.mrf.mxu0 }
  0xa7   : > { %1636 = vpow2.f32 %v1475_v32  ;;  %v530_v35 = vadd.f32 %v1945_v11, %v529_v34 }
  0xa8   : > { %1638 = vrcp.f32 %v595_v33  ;;  %v612_v48 = vand.u32 2147483647, %v595_v33  ;;  %v614_v49 = vand.u32 2147483648, %v595_v33  ;;  %vm608_vm3 = vweird.f32 %v595_v33 }
  0xa9   : > { %v553_v36 = vmul.f32 %v1956_v14, %v530_v35 }
  0xaa   : > { %vm613_vm5 = vcmp.eq.f32.partialorder %v612_v48, 8.507059e+37  ;;  %v615_v59 = vor.u32 1.1754944e-38, %v614_v49 }
  0xab   : > { %v1993_v37 = vadd.f32 %v1968_v19, %v553_v36 }
  0xad   : > { %v1637_v38 = vpop.eup %1636  ;;  %v1476_v39 = vmul.f32 -1.442695, %v1993_v37 }
  0xae   : > { %v1639_v40 = vpop.eup %1638  ;;  %v596_v41 = vadd.f32 1.0, %v1637_v38  ;;  %v532_v42 = vpop.f32.mrf.mxu0 }
  0xaf   : > { %1640 = vpow2.f32 %v1476_v39  ;;  %v533_v43 = vadd.f32 %v1945_v11, %v532_v42  ;;  %v604_v44 = vmul.f32 %v1639_v40, %v595_v33  ;;  %vm609_vm2 = vweird.f32 %v1639_v40 }
  0xb0   : > { %1642 = vrcp.f32 %v596_v41  ;;  %vm610_vm4 = vmor %vm608_vm3, %vm609_vm2  ;;  %v627_v4 = vand.u32 2147483647, %v596_v41  ;;  %v629_v5 = vand.u32 2147483648, %v596_v41  ;;  %vm623_vm8 = vweird.f32 %v596_v41 }
  0xb1   : > { %v554_v45 = vmul.f32 %v1956_v14, %v533_v43  ;;  %v605_v46 = vsub.f32 1.0, %v604_v44 }
  0xb2   : > { %vm628_vm10 = vcmp.eq.f32.partialorder %v627_v4, 8.507059e+37  ;;  %v630_v17 = vor.u32 1.1754944e-38, %v629_v5 }
  0xb3   : > { %v1999_v50 = vadd.f32 %v1968_v19, %v554_v45  ;;  %v606_v51 = vmul.f32 %v1639_v40, %v605_v46 }
  0xb5   : > { %v1641_v52 = vpop.eup %1640  ;;  %v1477_v53 = vmul.f32 -1.442695, %v1999_v50  ;;  %v607_v55 = vadd.f32 %v1639_v40, %v606_v51 }
  0xb6   : > { %v1643_v56 = vpop.eup %1642  ;;  %v597_v57 = vadd.f32 1.0, %v1641_v52  ;;  %v535_v58 = vpop.f32.mrf.mxu0 }
  0xb7   : > { %1644 = vpow2.f32 %v1477_v53  ;;  %v536_v60 = vadd.f32 %v1945_v11, %v535_v58  ;;  %v611_v61 = vsel %vm610_vm4, %v1639_v40, %v607_v55  ;;  %v619_v62 = vmul.f32 %v1643_v56, %v596_v41 }
  0xb8   : > { %1646 = vrcp.f32 %v597_v57  ;;  %v616_v63 = vsel %vm613_vm5, %v615_v59, %v611_v61  ;;  %vm624_vm7 = vweird.f32 %v1643_v56  ;;  %v642_v27 = vand.u32 2147483647, %v597_v57 }
  0xb9   : > { %v555_v1 = vmul.f32 %v1956_v14, %v536_v60  ;;  %v723_v2 = vmul.f32 %v616_v63, %v563_v25  ;;  %v620_v3 = vsub.f32 1.0, %v619_v62  ;;  %vm625_vm9 = vmor %vm623_vm8, %vm624_vm7  ;;  %v644_v28 = vand.u32 2147483648, %v597_v57 }
  0xba   : > { %vm638_vm12 = vweird.f32 %v597_v57  ;;  %vm643_vm14 = vcmp.eq.f32.partialorder %v642_v27, 8.507059e+37 }
  0xbb   : > { %v2007_v6 = vadd.f32 %v1968_v19, %v555_v1  ;;  %1482 = vmatmul.msk.f32.vlgmr.msra.gmra.mxu1 %vm739_vm6, %v723_v2  ;;  %1490 = vmatmul.msk.f32.vlgmr.msra.gmra.mxu2 %vm739_vm6, %v723_v2  ;;  %v621_v7 = vmul.f32 %v1643_v56, %v620_v3  ;;  %v645_v38 = vor.u32 1.1754944e-38, %v644_v28 }
  0xbd   : > { %v1645_v8 = vpop.eup %1644  ;;  %v1478_v10 = vmul.f32 -1.442695, %v2007_v6  ;;  %v622_v12 = vadd.f32 %v1643_v56, %v621_v7 }
  0xbe   : > { %v1647_v13 = vpop.eup %1646  ;;  %v598_v15 = vadd.f32 1.0, %v1645_v8  ;;  %v538_v16 = vpop.f32.mrf.mxu0 }
  0xbf   : > { %1648 = vpow2.f32 %v1478_v10  ;;  %v539_v18 = vadd.f32 %v1945_v11, %v538_v16  ;;  %v626_v20 = vsel %vm625_vm9, %v1643_v56, %v622_v12  ;;  %v634_v21 = vmul.f32 %v1647_v13, %v597_v57 }
  0xc0   : > { %1650 = vrcp.f32 %v598_v15  ;;  %v631_v22 = vsel %vm628_vm10, %v630_v17, %v626_v20  ;;  %vm639_vm11 = vweird.f32 %v1647_v13  ;;  %v659_v46 = vand.u32 2147483648, %v598_v15 }
  0xc1   : > { %v556_v24 = vmul.f32 %v1956_v14, %v539_v18  ;;  %v724_v25 = vmul.f32 %v631_v22, %v1987_v30  ;;  %v635_v26 = vsub.f32 1.0, %v634_v21  ;;  %1652 = vpow2.f32 %v1481_v23  ;;  %vm640_vm13 = vmor %vm638_vm12, %vm639_vm11 }
  0xc2   : > { %vm653_vm0 = vweird.f32 %v598_v15  ;;  %v660_v55 = vor.u32 1.1754944e-38, %v659_v46 }
  0xc3   : > { %v2020_v29 = vadd.f32 %v1968_v19, %v556_v24  ;;  %1483 = vmatmul.msk.f32.gmra.mxu1 %vm739_vm6, %v724_v25  ;;  %1491 = vmatmul.msk.f32.gmra.mxu2 %vm739_vm6, %v724_v25  ;;  %v636_v31 = vmul.f32 %v1647_v13, %v635_v26 }
  0xc5   : > { %v1649_v32 = vpop.eup %1648  ;;  %v1479_v33 = vmul.f32 -1.442695, %v2020_v29  ;;  %v637_v34 = vadd.f32 %v1647_v13, %v636_v31 }
  0xc6   : > { %v1651_v35 = vpop.eup %1650  ;;  %v599_v30 = vadd.f32 1.0, %v1649_v32  ;;  %v541_v36 = vpop.f32.mrf.mxu0 }
  0xc7   : > { %1654 = vpow2.f32 %v1479_v33  ;;  %v542_v39 = vadd.f32 %v1945_v11, %v541_v36  ;;  %v641_v40 = vsel %vm640_vm13, %v1647_v13, %v637_v34  ;;  %v649_v41 = vmul.f32 %v1651_v35, %v598_v15  ;;  %v1653_v47 = vpop.eup %1652 }
  0xc8   : > { %1656 = vrcp.f32 %v599_v30  ;;  %v646_v42 = vsel %vm643_vm14, %v645_v38, %v641_v40  ;;  %vm654_vm15 = vweird.f32 %v1651_v35  ;;  %v657_v11 = vand.u32 2147483647, %v598_v15 }
  0xc9   : > { %v557_v43 = vmul.f32 %v1956_v14, %v542_v39  ;;  %v725_v44 = vmul.f32 %v646_v42, %v1993_v37  ;;  %v650_v45 = vsub.f32 1.0, %v649_v41  ;;  %v2034_v37 = vadd.f32 1.0, %v1653_v47  ;;  %vm655_vm1 = vmor %vm653_vm0, %vm654_vm15 }
  0xca   : > { %vm658_vm2 = vcmp.eq.f32.partialorder %v657_v11, 8.507059e+37  ;;  %v674_v61 = vand.u32 2147483648, %v599_v30  ;;  %v672_v62 = vand.u32 2147483647, %v599_v30  ;;  %vm668_vm4 = vweird.f32 %v599_v30  ;;  %v2082_v11 = vld [vmem:[%s2430_s11] ss:$0 sm:$0xff] }
  0xcb   : > { %v2029_v48 = vadd.f32 %v1968_v19, %v557_v43  ;;  %1484 = vmatmul.msk.f32.gmra.mxu1 %vm739_vm6, %v725_v44  ;;  %1492 = vmatmul.msk.f32.gmra.mxu2 %vm739_vm6, %v725_v44  ;;  %v651_v49 = vmul.f32 %v1651_v35, %v650_v45  ;;  %vm713_vm14 = vweird.f32 %v2034_v37  ;;  %v719_v34 = vand.u32 2147483648, %v2034_v37  ;;  %v2059_v43 = vld [vmem:[%s2425_s6] ss:$0 sm:$0xff] }
  0xcc   : > { %v675_v4 = vor.u32 1.1754944e-38, %v674_v61  ;;  %vm673_vm7 = vcmp.eq.f32.partialorder %v672_v62, 8.507059e+37  ;;  %v2064_v44 = vld [vmem:[%s2426_s7] ss:$0 sm:$0xff] }
  0xcd   : > { %v1655_v51 = vpop.eup %1654  ;;  %v1480_v52 = vmul.f32 -1.442695, %v2029_v48  ;;  %v652_v53 = vadd.f32 %v1651_v35, %v651_v49  ;;  %v720_v39 = vor.u32 1.1754944e-38, %v719_v34 }
  0xce   : > { %v1657_v14 = vpop.eup %1656  ;;  %v600_v54 = vadd.f32 1.0, %v1655_v51 }
  0xcf   : > { %1658 = vpow2.f32 %v1480_v52  ;;  %v656_v19 = vsel %vm655_vm1, %v1651_v35, %v652_v53  ;;  %v664_v56 = vmul.f32 %v1657_v14, %v599_v30  ;;  %vm669_vm3 = vweird.f32 %v1657_v14 }
  0xd0   : > { %1660 = vrcp.f32 %v600_v54  ;;  %v661_v57 = vsel %vm658_vm2, %v660_v55, %v656_v19  ;;  %vm670_vm5 = vmor %vm668_vm4, %vm669_vm3  ;;  %v689_v12 = vand.u32 2147483648, %v600_v54  ;;  %v687_v15 = vand.u32 2147483647, %v600_v54 }
  0xd1   : > { %v726_v58 = vmul.f32 %v661_v57, %v1999_v50  ;;  %v665_v59 = vsub.f32 1.0, %v664_v56  ;;  %1662 = vrcp.f32 %v2034_v37  ;;  %vm683_vm9 = vweird.f32 %v600_v54 }
  0xd2   : > { %v690_v20 = vor.u32 1.1754944e-38, %v689_v12  ;;  %vm688_vm11 = vcmp.eq.f32.partialorder %v687_v15, 8.507059e+37  ;;  %v717_v30 = vand.u32 2147483647, %v2034_v37 }
  0xd3   : > { %1485 = vmatmul.msk.f32.gmra.mxu1 %vm739_vm6, %v726_v58  ;;  %1493 = vmatmul.msk.f32.gmra.mxu2 %vm739_vm6, %v726_v58  ;;  %v666_v60 = vmul.f32 %v1657_v14, %v665_v59 }
  0xd4   : > { %vm718_vm3 = vcmp.eq.f32.partialorder %v717_v30, 8.507059e+37 }
  0xd5   : > { %v1659_v63 = vpop.eup %1658  ;;  %v667_v0 = vadd.f32 %v1657_v14, %v666_v60 }
  0xd6   : > { %v1661_v1 = vpop.eup %1660  ;;  %v601_v2 = vadd.f32 1.0, %v1659_v63 }
  0xd7   : > { %v671_v3 = vsel %vm670_vm5, %v1657_v14, %v667_v0  ;;  %v679_v50 = vmul.f32 %v1661_v1, %v600_v54  ;;  %v1663_v5 = vpop.eup %1662  ;;  %vm684_vm8 = vweird.f32 %v1661_v1  ;;  %v2088_v14 = vld [vmem:[%s2431_s12] ss:$0 sm:$0xff] }
  0xd8   : > { %1664 = vrcp.f32 %v601_v2  ;;  %v676_v7 = vsel %vm673_vm7, %v675_v4, %v671_v3  ;;  %v709_v16 = vmul.f32 %v1663_v5, %v2034_v37  ;;  %vm685_vm10 = vmor %vm683_vm9, %vm684_vm8  ;;  %v704_v26 = vand.u32 2147483648, %v601_v2 }
  0xd9   : > { %v680_v8 = vsub.f32 1.0, %v679_v50  ;;  %v727_v10 = vmul.f32 %v676_v7, %v2007_v6  ;;  %v702_v28 = vand.u32 2147483647, %v601_v2  ;;  %vm698_vm13 = vweird.f32 %v601_v2 }
  0xda   : > { %v710_v23 = vsub.f32 1.0, %v709_v16  ;;  %vm714_vm15 = vweird.f32 %v1663_v5  ;;  %v705_v33 = vor.u32 1.1754944e-38, %v704_v26 }
  0xdb   : > { %v681_v13 = vmul.f32 %v1661_v1, %v680_v8  ;;  %1486 = vmatmul.msk.f32.gmra.mxu1 %vm739_vm6, %v727_v10  ;;  %1494 = vmatmul.msk.f32.gmra.mxu2 %vm739_vm6, %v727_v10  ;;  %vm703_vm1 = vcmp.eq.f32.partialorder %v702_v28, 8.507059e+37  ;;  %vm715_vm2 = vmor %vm713_vm14, %vm714_vm15 }
  0xdc   : > { %v711_v31 = vmul.f32 %v1663_v5, %v710_v23 }
  0xdd   : > { %v682_v17 = vadd.f32 %v1661_v1, %v681_v13 }
  0xde   : > { %v1665_v18 = vpop.eup %1664 }
  0xdf   : > { %v694_v21 = vmul.f32 %v1665_v18, %v601_v2  ;;  %v686_v22 = vsel %vm685_vm10, %v1661_v1, %v682_v17  ;;  %vm699_vm12 = vweird.f32 %v1665_v18 }
  0xe0   : > { %v691_v6 = vsel %vm688_vm11, %v690_v20, %v686_v22  ;;  %vm700_vm0 = vmor %vm698_vm13, %vm699_vm12 }
  0xe1   : > { %v695_v24 = vsub.f32 1.0, %v694_v21  ;;  %v728_v25 = vmul.f32 %v691_v6, %v2020_v29  ;;  %v712_v29 = vadd.f32 %v1663_v5, %v711_v31 }
  0xe3   : > { %v696_v27 = vmul.f32 %v1665_v18, %v695_v24  ;;  %1487 = vmatmul.msk.f32.gmra.mxu1 %vm739_vm6, %v728_v25  ;;  %1495 = vmatmul.msk.f32.gmra.mxu2 %vm739_vm6, %v728_v25  ;;  %v716_v40 = vsel %vm715_vm2, %v1663_v5, %v712_v29 }
  0xe4   : > { %v721_v41 = vsel %vm718_vm3, %v720_v39, %v716_v40 }
  0xe5   : > { %v697_v32 = vadd.f32 %v1665_v18, %v696_v27  ;;  %v730_v42 = vmul.f32 %v721_v41, %v2012_v9  ;;  %v2070_v9 = vld [vmem:[%s2427_s8] ss:$0 sm:$0xff] }
  0xe7   : > { %v701_v35 = vsel %vm700_vm0, %v1665_v18, %v697_v32 }
  0xe8   : > { %v706_v36 = vsel %vm703_vm1, %v705_v33, %v701_v35 }
  0xe9   : > { %v729_v38 = vmul.f32 %v706_v36, %v2029_v48  ;;  %v2076_v48 = vld [vmem:[%s2429_s10] ss:$0 sm:$0xff] }
  0xeb   : > { %1488 = vmatmul.msk.f32.vlgmr.msrb.gmra.mxu3 %vm739_vm6, %v729_v38 }
  0xf3   : > { %1489 = vmatmul.msk.f32.gmra.mxu3 %vm739_vm6, %v730_v42 }
  0xfb   : > { %1496 = vmatmul.msk.f32.vlgmr.msra.gmra.mxu3 %vm739_vm6, %v729_v38 }
 0x103   : > { %1497 = vmatmul.msk.f32.gmra.mxu3 %vm739_vm6, %v730_v42 }
 0x138   : > { %v781_v45 = vpop.f32.mrf.mxu1 }
 0x139   : > { %v782_v46 = vadd.f32 %v2059_v43, %v781_v45 }
 0x13b   : > { %v809_v47 = vmul.f32 %v2064_v44, %v782_v46 }
 0x13d   : > { %v821_v49 = vadd.f32 %v2070_v9, %v809_v47 }
 0x13e   : > { %v854_v51 = vpop.f32.mrf.mxu2 }
 0x13f   : > { %v1498_v52 = vmul.f32 -1.442695, %v821_v49  ;;  %v855_v53 = vadd.f32 %v2076_v48, %v854_v51 }
 0x140   : > { %v784_v37 = vpop.f32.mrf.mxu1 }
 0x141   : > { %1666 = vpow2.f32 %v1498_v52  ;;  %v882_v54 = vmul.f32 %v2082_v11, %v855_v53  ;;  %v785_v55 = vadd.f32 %v2059_v43, %v784_v37 }
 0x143   : > { %v2093_v19 = vadd.f32 %v2088_v14, %v882_v54  ;;  %v810_v56 = vmul.f32 %v2064_v44, %v785_v55 }
 0x145   : > { %v1078_v57 = vand.u32 2147483647, %v2093_v19  ;;  %v822_v58 = vadd.f32 %v2070_v9, %v810_v56  ;;  %v1054_v40 = vmax.f32 %v2093_v19, 0.0  ;;  %vm1062_vm7 = vcmp.ne.f32.partialorder %v2093_v19, %v2093_v19 }
 0x146   : > { %v857_v59 = vpop.f32.mrf.mxu2 }
 0x147   : > { %v1667_v60 = vpop.eup %1666  ;;  %v1086_v61 = vsub.f32 0.0, %v1078_v57  ;;  %v1499_v62 = vmul.f32 -1.442695, %v822_v58  ;;  %v858_v63 = vadd.f32 %v2076_v48, %v857_v59 }
 0x148   : > { %v2099_v0 = vadd.f32 1.0, %v1667_v60  ;;  %v787_v1 = vpop.f32.mrf.mxu1 }
 0x149   : > { %v1094_v2 = vmul.f32 1.442695, %v1086_v61  ;;  %1668 = vpow2.f32 %v1499_v62  ;;  %v883_v3 = vmul.f32 %v2082_v11, %v858_v63  ;;  %v788_v4 = vadd.f32 %v2059_v43, %v787_v1 }
 0x14a   : > { %1670 = vrcp.f32 %v2099_v0  ;;  %v945_v34 = vand.u32 2147483648, %v2099_v0  ;;  %vm939_vm5 = vweird.f32 %v2099_v0  ;;  %v943_v45 = vand.u32 2147483647, %v2099_v0 }
 0x14b   : > { %1672 = vpow2.f32 %v1094_v2  ;;  %v2105_v50 = vadd.f32 %v2088_v14, %v883_v3  ;;  %v811_v5 = vmul.f32 %v2064_v44, %v788_v4 }
 0x14c   : > { %v946_v57 = vor.u32 1.1754944e-38, %v945_v34  ;;  %vm944_vm10 = vcmp.eq.f32.partialorder %v943_v45, 8.507059e+37 }
 0x14d   : > { %v1079_v7 = vand.u32 2147483647, %v2105_v50  ;;  %v823_v8 = vadd.f32 %v2070_v9, %v811_v5  ;;  %vm1063_vm0 = vcmp.ne.f32.partialorder %v2105_v50, %v2105_v50 }
 0x14e   : > { %v860_v10 = vpop.f32.mrf.mxu2 }
 0x14f   : > { %v1669_v12 = vpop.eup %1668  ;;  %v1087_v13 = vsub.f32 0.0, %v1079_v7  ;;  %v1500_v15 = vmul.f32 -1.442695, %v823_v8  ;;  %v861_v18 = vadd.f32 %v2076_v48, %v860_v10 }
 0x150   : > { %v1671_v16 = vpop.eup %1670  ;;  %v2110_v17 = vadd.f32 1.0, %v1669_v12  ;;  %v790_v20 = vpop.f32.mrf.mxu1 }
 0x151   : > { %v1673_v21 = vpop.eup %1672  ;;  %v935_v22 = vmul.f32 %v1671_v16, %v2099_v0  ;;  %v1096_v23 = vmul.f32 1.442695, %v1087_v13  ;;  %1674 = vpow2.f32 %v1500_v15  ;;  %v884_v26 = vmul.f32 %v2082_v11, %v861_v18 }
 0x152   : > { %v1110_v6 = vadd.f32 1.0, %v1673_v21  ;;  %v1113_v24 = vmul.f32 -0.5, %v1673_v21  ;;  %1676 = vrcp.f32 %v2110_v17  ;;  %vm940_vm4 = vweird.f32 %v1671_v16 }
 0x153   : > { %v936_v25 = vsub.f32 1.0, %v935_v22  ;;  %v2117_v31 = vadd.f32 %v2088_v14, %v884_v26  ;;  %v791_v35 = vadd.f32 %v2059_v43, %v790_v20  ;;  %v1116_v36 = vand.u32 2147483647, %v1673_v21  ;;  %vm2137_vm8 = vmor %vm939_vm5, %vm940_vm4 }
 0x154   : > { %1678 = vlog2.f32 %v1110_v6  ;;  %v1114_v28 = vadd.f32 1.0, %v1113_v24  ;;  %v1055_v18 = vmax.f32 %v2105_v50, 0.0  ;;  %vm954_vm12 = vweird.f32 %v2110_v17 }
 0x155   : > { %v937_v27 = vmul.f32 %v1671_v16, %v936_v25  ;;  %1680 = vpow2.f32 %v1096_v23  ;;  %v1080_v39 = vand.u32 2147483647, %v2117_v31  ;;  %v812_v55 = vmul.f32 %v2064_v44, %v791_v35 }
 0x156   : > { %v863_v32 = vpop.f32.mrf.mxu2  ;;  %v1115_v46 = vmul.f32 %v1673_v21, %v1114_v28  ;;  %vm1117_vm9 = vcmp.lt.f32.partialorder %v1116_v36, 0.0004427343  ;;  %v958_v22 = vand.u32 2147483647, %v2110_v17  ;;  %v960_v23 = vand.u32 2147483648, %v2110_v17 }
 0x157   : > { %v1675_v33 = vpop.eup %1674  ;;  %v938_v30 = vadd.f32 %v1671_v16, %v937_v27  ;;  %v864_v47 = vadd.f32 %v2076_v48, %v863_v32  ;;  %v1088_v54 = vsub.f32 0.0, %v1080_v39  ;;  %v824_v1 = vadd.f32 %v2070_v9, %v812_v55 }
 0x158   : > { %v2121_v29 = vpop.eup %1676  ;;  %v2123_v38 = vadd.f32 1.0, %v1675_v33  ;;  %v793_v49 = vpop.f32.mrf.mxu1  ;;  %vm959_vm15 = vcmp.eq.f32.partialorder %v958_v22, 8.507059e+37  ;;  %vm1064_vm3 = vcmp.ne.f32.partialorder %v2117_v31, %v2117_v31 }
 0x159   : > { %v950_v41 = vmul.f32 %v2121_v29, %v2110_v17  ;;  %v942_v56 = vsel %vm2137_vm8, %v1671_v16, %v938_v30  ;;  %v1098_v62 = vmul.f32 1.442695, %v1088_v54  ;;  %vm955_vm11 = vweird.f32 %v2121_v29 }
 0x15a   : > { %v1679_v42 = vpop.eup %1678  ;;  %1682 = vrcp.f32 %v2123_v38  ;;  %v947_v0 = vsel %vm944_vm10, %v946_v57, %v942_v56  ;;  %v885_v2 = vmul.f32 %v2082_v11, %v864_v47  ;;  %v794_v8 = vadd.f32 %v2059_v43, %v793_v49  ;;  %vm2174_vm13 = vmor %vm954_vm12, %vm955_vm11 }
 0x15b   : > { %v1681_v51 = vpop.eup %1680  ;;  %v1112_v53 = vmul.f32 0.6931472, %v1679_v42  ;;  %v951_v37 = vsub.f32 1.0, %v950_v41  ;;  %v1501_v20 = vmul.f32 -1.442695, %v824_v1  ;;  %v961_v42 = vor.u32 1.1754944e-38, %v960_v23 }
 0x15c   : > { %v1119_v58 = vadd.f32 1.0, %v1681_v51  ;;  %v1122_v61 = vmul.f32 -0.5, %v1681_v51  ;;  %v1125_v7 = vand.u32 2147483647, %v1681_v51  ;;  %v2161_v21 = vadd.f32 %v2088_v14, %v885_v2 }
 0x15d   : > { %v1118_v59 = vsel %vm1117_vm9, %v1115_v46, %v1112_v53  ;;  %v952_v60 = vmul.f32 %v2121_v29, %v951_v37  ;;  %v1056_v1 = vmax.f32 %v2117_v31, 0.0  ;;  %vm969_vm2 = vweird.f32 %v2123_v38 }
 0x15e   : > { %v1182_v63 = vadd.f32 %v1118_v59, %v1054_v40  ;;  %1684 = vlog2.f32 %v1119_v58  ;;  %v866_v3 = vpop.f32.mrf.mxu2  ;;  %v1123_v15 = vadd.f32 1.0, %v1122_v61  ;;  %vm2178_vm14 = vcmp.lt.f32.partialorder %v1125_v7, 0.0004427343 }
 0x15f   : > { %1686 = vpow2.f32 %v1098_v62  ;;  %v867_v10 = vadd.f32 %v2076_v48, %v866_v3  ;;  %v953_v13 = vadd.f32 %v2121_v29, %v952_v60  ;;  %v1081_v28 = vand.u32 2147483647, %v2161_v21 }
 0x160   : > { %v2148_v4 = vpop.eup %1682  ;;  %v1190_v5 = vsel %vm1062_vm7, %v2093_v19, %v1182_v63  ;;  %v813_v19 = vmul.f32 %v2064_v44, %v794_v8  ;;  %1688 = vpow2.f32 %v1501_v20  ;;  %v796_v32 = vpop.f32.mrf.mxu1  ;;  %v1124_v35 = vmul.f32 %v1681_v51, %v1123_v15 }
 0x161   : > { %v1198_v12 = vmul.f32 %v1190_v5, %v947_v0  ;;  %v965_v16 = vmul.f32 %v2148_v4, %v2123_v38  ;;  %v886_v6 = vmul.f32 %v2082_v11, %v867_v10  ;;  %v957_v17 = vsel %vm2174_vm13, %v2121_v29, %v953_v13 }
 0x162   : > { %v825_v30 = vadd.f32 %v2070_v9, %v813_v19  ;;  %v1089_v40 = vsub.f32 0.0, %v1081_v28  ;;  %v797_v47 = vadd.f32 %v2059_v43, %v796_v32  ;;  %v962_v51 = vsel %vm959_vm15, %v961_v42, %v957_v17 }
 0x163   : > { %1206 = vst.msk [vmem:[%s2164_s24] sm:$0xff] %vm739_vm6, %v1198_v12  ;;  %v966_v27 = vsub.f32 1.0, %v965_v16  ;;  %v2188_v41 = vadd.f32 %v2088_v14, %v886_v6  ;;  %vm970_vm1 = vweird.f32 %v2148_v4  ;;  %v975_v0 = vand.u32 2147483648, %v2123_v38 }
 0x164   : > { %v1685_v24 = vpop.eup %1684  ;;  %v1502_v46 = vmul.f32 -1.442695, %v825_v30  ;;  %v1100_v52 = vmul.f32 1.442695, %v1089_v40  ;;  %v814_v60 = vmul.f32 %v2064_v44, %v797_v47  ;;  %vm2216_vm4 = vmor %vm969_vm2, %vm970_vm1  ;;  %v1057_v30 = vmax.f32 %v2161_v21, 0.0 }
 0x165   : > { %v1687_v33 = vpop.eup %1686  ;;  %v1121_v34 = vmul.f32 0.6931472, %v1685_v24  ;;  %v967_v29 = vmul.f32 %v2148_v4, %v966_v27  ;;  %v1082_v57 = vand.u32 2147483647, %v2188_v41  ;;  %v976_v19 = vor.u32 1.1754944e-38, %v975_v0 }
 0x166   : > { %v1128_v36 = vadd.f32 1.0, %v1687_v33  ;;  %v1131_v39 = vmul.f32 -0.5, %v1687_v33  ;;  %v869_v53 = vpop.f32.mrf.mxu2  ;;  %v1689_v37 = vpop.eup %1688  ;;  %v1134_v56 = vand.u32 2147483647, %v1687_v33  ;;  %v826_v5 = vadd.f32 %v2070_v9, %v814_v60 }
 0x167   : > { %v1127_v45 = vsel %vm2178_vm14, %v1124_v35, %v1121_v34  ;;  %v2198_v59 = vadd.f32 1.0, %v1689_v37  ;;  %v968_v61 = vadd.f32 %v2148_v4, %v967_v29  ;;  %v1090_v62 = vsub.f32 0.0, %v1082_v57 }
 0x168   : > { %v1183_v49 = vadd.f32 %v1127_v45, %v1055_v18  ;;  %1690 = vlog2.f32 %v1128_v36  ;;  %v1132_v55 = vadd.f32 1.0, %v1131_v39  ;;  %v870_v63 = vadd.f32 %v2076_v48, %v869_v53 }
 0x169   : > { %1692 = vpow2.f32 %v1502_v46  ;;  %v1102_v3 = vmul.f32 1.442695, %v1090_v62  ;;  %vm1135_vm5 = vcmp.lt.f32.partialorder %v1134_v56, 0.0004427343  ;;  %v1503_v26 = vmul.f32 -1.442695, %v826_v5 }
 0x16a   : > { %v1191_v54 = vsel %vm1063_vm0, %v2105_v50, %v1183_v49  ;;  %1694 = vpow2.f32 %v1100_v52  ;;  %v973_v50 = vand.u32 2147483647, %v2123_v38  ;;  %v1133_v13 = vmul.f32 %v1687_v33, %v1132_v55 }
 0x16b   : > { %v1199_v58 = vmul.f32 %v1191_v54, %v962_v51  ;;  %1696 = vrcp.f32 %v2198_v59  ;;  %v972_v38 = vsel %vm2216_vm4, %v2148_v4, %v968_v61  ;;  %v887_v18 = vmul.f32 %v2082_v11, %v870_v63 }
 0x16c   : > { %1698 = vpow2.f32 %v1102_v3  ;;  %vm974_vm7 = vcmp.eq.f32.partialorder %v973_v50, 8.507059e+37  ;;  %v988_v32 = vand.u32 2147483647, %v2198_v59  ;;  %v990_v4 = vand.u32 2147483648, %v2198_v59 }
 0x16d   : > { %1207 = vst.msk [vmem:[%s2164_s24 + $0x8] sm:$0xff] %vm739_vm6, %v1199_v58  ;;  %v977_v28 = vsel %vm974_vm7, %v976_v19, %v972_v38  ;;  %v2237_v34 = vadd.f32 %v2088_v14, %v887_v18  ;;  %vm984_vm8 = vweird.f32 %v2198_v59  ;;  %vm1065_vm10 = vcmp.ne.f32.partialorder %v2161_v21, %v2161_v21 }
 0x16e   : > { %v1691_v2 = vpop.eup %1690  ;;  %v799_v7 = vpop.f32.mrf.mxu3  ;;  %vm2243_vm9 = vcmp.eq.f32.partialorder %v988_v32, 8.507059e+37  ;;  %v991_v46 = vor.u32 1.1754944e-38, %v990_v4 }
 0x16f   : > { %v1693_v8 = vpop.eup %1692  ;;  %v1130_v12 = vmul.f32 0.6931472, %v1691_v2  ;;  %v800_v15 = vadd.f32 %v2059_v43, %v799_v7  ;;  %v1083_v51 = vand.u32 2147483647, %v2237_v34 }
 0x170   : > { %v2224_v16 = vadd.f32 1.0, %v1693_v8  ;;  %v1695_v20 = vpop.eup %1694 }
 0x171   : > { %v1136_v22 = vsel %vm1135_vm5, %v1133_v13, %v1130_v12  ;;  %v815_v23 = vmul.f32 %v2064_v44, %v800_v15  ;;  %v1137_v24 = vadd.f32 1.0, %v1695_v20  ;;  %v1140_v25 = vmul.f32 -0.5, %v1695_v20  ;;  %v1697_v27 = vpop.eup %1696 }
 0x172   : > { %v1184_v6 = vadd.f32 %v1136_v22, %v1056_v1  ;;  %1700 = vrcp.f32 %v2224_v16  ;;  %v980_v17 = vmul.f32 %v1697_v27, %v2198_v59  ;;  %v1143_v36 = vand.u32 2147483647, %v1695_v20  ;;  %v1699_v39 = vpop.eup %1698 }
 0x173   : > { %1702 = vlog2.f32 %v1137_v24  ;;  %v1141_v42 = vadd.f32 1.0, %v1140_v25  ;;  %v1146_v47 = vadd.f32 1.0, %v1699_v39  ;;  %v1149_v49 = vmul.f32 -0.5, %v1699_v39 }
 0x174   : > { %v1192_v33 = vsel %vm1064_vm3, %v2117_v31, %v1184_v6  ;;  %v981_v40 = vsub.f32 1.0, %v980_v17  ;;  %1704 = vpow2.f32 %v1503_v26  ;;  %vm985_vm11 = vweird.f32 %v1697_v27 }
 0x175   : > { %v1200_v35 = vmul.f32 %v1192_v33, %v977_v28  ;;  %vm999_vm12 = vweird.f32 %v2224_v16  ;;  %v827_v52 = vadd.f32 %v2070_v9, %v815_v23  ;;  %vm2252_vm13 = vcmp.lt.f32.partialorder %v1143_v36, 0.0004427343  ;;  %vm2261_vm14 = vmor %vm984_vm8, %vm985_vm11 }
 0x176   : > { %v802_v45 = vpop.f32.mrf.mxu3  ;;  %v982_v29 = vmul.f32 %v1697_v27, %v981_v40  ;;  %v1003_v54 = vand.u32 2147483647, %v2224_v16  ;;  %1706 = vlog2.f32 %v1146_v47  ;;  %v1142_v58 = vmul.f32 %v1695_v20, %v1141_v42 }
 0x177   : > { %1208 = vst.msk [vmem:[%s2164_s24 + $0x10] sm:$0xff] %vm739_vm6, %v1200_v35  ;;  %v803_v55 = vadd.f32 %v2059_v43, %v802_v45  ;;  %v1091_v61 = vsub.f32 0.0, %v1083_v51  ;;  %v1150_v50 = vadd.f32 1.0, %v1149_v49  ;;  %v1504_v0 = vmul.f32 -1.442695, %v827_v52 }
 0x178   : > { %v1701_v53 = vpop.eup %1700  ;;  %v983_v57 = vadd.f32 %v1697_v27, %v982_v29  ;;  %v1152_v5 = vand.u32 2147483647, %v1699_v39  ;;  %v1005_v18 = vand.u32 2147483648, %v2224_v16  ;;  %v1058_v25 = vmax.f32 %v2188_v41, 0.0 }
 0x179   : > { %v1703_v56 = vpop.eup %1702  ;;  %v995_v60 = vmul.f32 %v1701_v53, %v2224_v16  ;;  %v816_v1 = vmul.f32 %v2064_v44, %v803_v55  ;;  %v1104_v7 = vmul.f32 1.442695, %v1091_v61  ;;  %vm1000_vm15 = vweird.f32 %v1701_v53 }
 0x17a   : > { %v1139_v63 = vmul.f32 0.6931472, %v1703_v56  ;;  %v1705_v2 = vpop.eup %1704  ;;  %v987_v43 = vsel %vm2261_vm14, %v1697_v27, %v983_v57  ;;  %1708 = vpow2.f32 %v1504_v0  ;;  %v1151_v20 = vmul.f32 %v1699_v39, %v1150_v50  ;;  %vm2284_vm0 = vmor %vm999_vm12, %vm1000_vm15 }
 0x17b   : > { %v996_v3 = vsub.f32 1.0, %v995_v60  ;;  %v2270_v59 = vadd.f32 1.0, %v1705_v2  ;;  %1710 = vpow2.f32 %v1104_v7  ;;  %v828_v13 = vadd.f32 %v2070_v9, %v816_v1 }
 0x17c   : > { %v1145_v8 = vsel %vm2252_vm13, %v1142_v58, %v1139_v63  ;;  %v1707_v15 = vpop.eup %1706  ;;  %v992_v38 = vsel %vm2243_vm9, %v991_v46, %v987_v43  ;;  %vm1153_vm1 = vcmp.lt.f32.partialorder %v1152_v5, 0.0004427343  ;;  %v1006_v32 = vor.u32 1.1754944e-38, %v1005_v18 }
 0x17d   : > { %v1185_v10 = vadd.f32 %v1145_v8, %v1057_v30  ;;  %v997_v12 = vmul.f32 %v1701_v53, %v996_v3  ;;  %1712 = vrcp.f32 %v2270_v59  ;;  %v1148_v23 = vmul.f32 0.6931472, %v1707_v15 }
 0x17e   : > { %v872_v44 = vpop.f32.mrf.mxu3  ;;  %v1505_v6 = vmul.f32 -1.442695, %v828_v13  ;;  %vm1004_vm2 = vcmp.eq.f32.partialorder %v1003_v54, 8.507059e+37  ;;  %vm1066_vm3 = vcmp.ne.f32.partialorder %v2188_v41, %v2188_v41  ;;  %vm1014_vm5 = vweird.f32 %v2270_v59 }
 0x17f   : > { %v1193_v19 = vsel %vm1065_vm10, %v2161_v21, %v1185_v10  ;;  %v998_v22 = vadd.f32 %v1701_v53, %v997_v12  ;;  %v873_v26 = vadd.f32 %v2076_v48, %v872_v44  ;;  %v1154_v21 = vsel %vm1153_vm1, %v1151_v20, %v1148_v23 }
 0x180   : > { %v1201_v9 = vmul.f32 %v1193_v19, %v992_v38  ;;  %1714 = vpow2.f32 %v1505_v6  ;;  %v1709_v28 = vpop.eup %1708  ;;  %v1186_v4 = vadd.f32 %v1154_v21, %v1058_v25  ;;  %v1020_v57 = vand.u32 2147483648, %v2270_v59 }
 0x181   : > { %v1002_v27 = vsel %vm2284_vm0, %v1701_v53, %v998_v22  ;;  %v1711_v16 = vpop.eup %1710  ;;  %v888_v33 = vmul.f32 %v2082_v11, %v873_v26  ;;  %v2299_v45 = vadd.f32 1.0, %v1709_v28  ;;  %v1059_v50 = vmax.f32 %v2237_v34, 0.0 }
 0x182   : > { %1209 = vst.msk [vmem:[%s2164_s24 + $0x18] sm:$0xff] %vm739_vm6, %v1201_v9  ;;  %v1007_v35 = vsel %vm1004_vm2, %v1006_v32, %v1002_v27  ;;  %v1194_v30 = vsel %vm1066_vm3, %v2188_v41, %v1186_v4  ;;  %v1155_v36 = vadd.f32 1.0, %v1711_v16  ;;  %v1158_v42 = vmul.f32 -0.5, %v1711_v16 }
 0x183   : > { %v1713_v17 = vpop.eup %1712  ;;  %v1202_v39 = vmul.f32 %v1194_v30, %v1007_v35  ;;  %v2304_v49 = vadd.f32 %v2088_v14, %v888_v33  ;;  %v1161_v52 = vand.u32 2147483647, %v1711_v16  ;;  %vm1067_vm10 = vcmp.ne.f32.partialorder %v2237_v34, %v2237_v34 }
 0x184   : > { %v1010_v40 = vmul.f32 %v1713_v17, %v2270_v59  ;;  %1716 = vlog2.f32 %v1155_v36  ;;  %v1159_v41 = vadd.f32 1.0, %v1158_v42  ;;  %vm1015_vm4 = vweird.f32 %v1713_v17 }
 0x185   : > { %1210 = vst.msk [vmem:[%s2164_s24 + $0x20] sm:$0xff] %vm739_vm6, %v1202_v39  ;;  %1718 = vrcp.f32 %v2299_v45  ;;  %v1084_v37 = vand.u32 2147483647, %v2304_v49  ;;  %vm2318_vm7 = vmor %vm1014_vm5, %vm1015_vm4  ;;  %vm1162_vm8 = vcmp.lt.f32.partialorder %v1161_v52, 0.0004427343  ;;  %v1035_v28 = vand.u32 2147483648, %v2299_v45 }
 0x186   : > { %v875_v31 = vpop.f32.mrf.mxu3  ;;  %v1715_v46 = vpop.eup %1714  ;;  %v1011_v47 = vsub.f32 1.0, %v1010_v40  ;;  %v1160_v61 = vmul.f32 %v1711_v16, %v1159_v41  ;;  %v1033_v26 = vand.u32 2147483647, %v2299_v45  ;;  %vm1029_vm12 = vweird.f32 %v2299_v45 }
 0x187   : > { %v876_v29 = vadd.f32 %v2076_v48, %v875_v31  ;;  %v2308_v53 = vadd.f32 1.0, %v1715_v46  ;;  %v1092_v58 = vsub.f32 0.0, %v1084_v37  ;;  %v1018_v48 = vand.u32 2147483647, %v2270_v59 }
 0x188   : > { %v1012_v51 = vmul.f32 %v1713_v17, %v1011_v47  ;;  %v1060_v33 = vmax.f32 %v2304_v49, 0.0  ;;  %vm1034_vm15 = vcmp.eq.f32.partialorder %v1033_v26, 8.507059e+37  ;;  %v1036_v39 = vor.u32 1.1754944e-38, %v1035_v28 }
 0x189   : > { %v889_v55 = vmul.f32 %v2082_v11, %v876_v29  ;;  %1720 = vrcp.f32 %v2308_v53  ;;  %v1106_v11 = vmul.f32 1.442695, %v1092_v58  ;;  %vm1019_vm9 = vcmp.eq.f32.partialorder %v1018_v48, 8.507059e+37 }
 0x18a   : > { %v1013_v54 = vadd.f32 %v1713_v17, %v1012_v51  ;;  %v1717_v56 = vpop.eup %1716  ;;  %vm1044_vm1 = vweird.f32 %v2308_v53  ;;  %vm1068_vm2 = vcmp.ne.f32.partialorder %v2304_v49, %v2304_v49  ;;  %v1048_v31 = vand.u32 2147483647, %v2308_v53 }
 0x18b   : > { %v1157_v60 = vmul.f32 0.6931472, %v1717_v56  ;;  %v2316_v62 = vadd.f32 %v2088_v14, %v889_v55  ;;  %v1719_v0 = vpop.eup %1718  ;;  %v1021_v14 = vor.u32 1.1754944e-38, %v1020_v57  ;;  %1722 = vpow2.f32 %v1106_v11 }
 0x18c   : > { %v1017_v1 = vsel %vm2318_vm7, %v1713_v17, %v1013_v54  ;;  %v1025_v59 = vmul.f32 %v1719_v0, %v2299_v45  ;;  %vm1030_vm11 = vweird.f32 %v1719_v0  ;;  %v1050_v46 = vand.u32 2147483648, %v2308_v53 }
 0x18d   : > { %v1163_v2 = vsel %vm1162_vm8, %v1160_v61, %v1157_v60  ;;  %v1085_v43 = vand.u32 2147483647, %v2316_v62  ;;  %v1022_v7 = vsel %vm1019_vm9, %v1021_v14, %v1017_v1  ;;  %vm2337_vm13 = vmor %vm1029_vm12, %vm1030_vm11  ;;  %v1061_v37 = vmax.f32 %v2316_v62, 0.0 }
 0x18e   : > { %v1187_v3 = vadd.f32 %v1163_v2, %v1059_v50  ;;  %v1026_v15 = vsub.f32 1.0, %v1025_v59  ;;  %v1051_v56 = vor.u32 1.1754944e-38, %v1050_v46  ;;  %vm1049_vm5 = vcmp.eq.f32.partialorder %v1048_v31, 8.507059e+37 }
 0x18f   : > { %v1093_v5 = vsub.f32 0.0, %v1085_v43  ;;  %v1721_v13 = vpop.eup %1720  ;;  %vm1069_vm7 = vcmp.ne.f32.partialorder %v2316_v62, %v2316_v62 }
 0x190   : > { %v1195_v8 = vsel %vm1067_vm10, %v2237_v34, %v1187_v3  ;;  %v1040_v38 = vmul.f32 %v1721_v13, %v2308_v53  ;;  %v1027_v19 = vmul.f32 %v1719_v0, %v1026_v15  ;;  %vm1045_vm0 = vweird.f32 %v1721_v13 }
 0x191   : > { %v1203_v10 = vmul.f32 %v1195_v8, %v1022_v7  ;;  %v1108_v12 = vmul.f32 1.442695, %v1093_v5  ;;  %v1723_v44 = vpop.eup %1722  ;;  %vm1046_vm3 = vmor %vm1044_vm1, %vm1045_vm0 }
 0x192   : > { %v1164_v18 = vadd.f32 1.0, %v1723_v44  ;;  %v1167_v20 = vmul.f32 -0.5, %v1723_v44  ;;  %v1041_v23 = vsub.f32 1.0, %v1040_v38  ;;  %v1170_v9 = vand.u32 2147483647, %v1723_v44 }
 0x193   : > { %1211 = vst.msk [vmem:[%s2164_s24 + $0x28] sm:$0xff] %vm739_vm6, %v1203_v10  ;;  %1724 = vpow2.f32 %v1108_v12  ;;  %v1028_v25 = vadd.f32 %v1719_v0, %v1027_v19 }
 0x194   : > { %1726 = vlog2.f32 %v1164_v18  ;;  %v1168_v6 = vadd.f32 1.0, %v1167_v20  ;;  %v1042_v21 = vmul.f32 %v1721_v13, %v1041_v23  ;;  %vm1171_vm14 = vcmp.lt.f32.partialorder %v1170_v9, 0.0004427343 }
 0x195   : > { %v1032_v35 = vsel %vm2337_vm13, %v1719_v0, %v1028_v25 }
 0x196   : > { %v1169_v4 = vmul.f32 %v1723_v44, %v1168_v6  ;;  %v1043_v42 = vadd.f32 %v1721_v13, %v1042_v21  ;;  %v1037_v47 = vsel %vm1034_vm15, %v1036_v39, %v1032_v35 }
 0x198   : > { %v1047_v54 = vsel %vm1046_vm3, %v1721_v13, %v1043_v42 }
 0x199   : > { %v1725_v22 = vpop.eup %1724  ;;  %v1052_v53 = vsel %vm1049_vm5, %v1051_v56, %v1047_v54 }
 0x19a   : > { %v1173_v34 = vadd.f32 1.0, %v1725_v22  ;;  %v1176_v24 = vmul.f32 -0.5, %v1725_v22  ;;  %v1727_v27 = vpop.eup %1726  ;;  %v1179_v36 = vand.u32 2147483647, %v1725_v22 }
 0x19b   : > { %v1166_v32 = vmul.f32 0.6931472, %v1727_v27 }
 0x19c   : > { %1728 = vlog2.f32 %v1173_v34  ;;  %v1177_v17 = vadd.f32 1.0, %v1176_v24  ;;  %vm1180_vm4 = vcmp.lt.f32.partialorder %v1179_v36, 0.0004427343 }
 0x19d   : > { %v1172_v30 = vsel %vm1171_vm14, %v1169_v4, %v1166_v32 }
 0x19e   : > { %v1188_v40 = vadd.f32 %v1172_v30, %v1060_v33  ;;  %v1178_v41 = vmul.f32 %v1725_v22, %v1177_v17 }
 0x1a0   : > { %v1196_v29 = vsel %vm1068_vm2, %v2304_v49, %v1188_v40 }
 0x1a1   : > { %v1204_v52 = vmul.f32 %v1196_v29, %v1037_v47 }
 0x1a2   : > { %v1729_v45 = vpop.eup %1728 }
 0x1a3   : > { %v1175_v51 = vmul.f32 0.6931472, %v1729_v45  ;;  %1212 = vst.msk [vmem:[%s2164_s24 + $0x30] sm:$0xff] %vm739_vm6, %v1204_v52 }
 0x1a5   : > { %v1181_v55 = vsel %vm1180_vm4, %v1178_v41, %v1175_v51 }
 0x1a6   : > { %v1189_v57 = vadd.f32 %v1181_v55, %v1061_v37 }
 0x1a7   : > { %1220 = sbr.rel (!%p1913_p4) target bundleno = 470 (0x1d6), region = 76 }
 0x1a8   : > { %v1197_v49 = vsel %vm1069_vm7, %v2316_v62, %v1189_v57 }
 0x1a9   : > { %v1205_v58 = vmul.f32 %v1197_v49, %v1052_v53 }
 0x1ab   : > { %1213 = vst.msk [vmem:[%s2164_s24 + $0x38] sm:$0xff] %vm739_vm6, %v1205_v58 }
 0x1ac   : > { %s2466_s27 = smov (!%p1223_p8, %s1222_s27), 8 }
 0x1ad   : > { %s1508_s19 = sshll.u32 %s2466_s27, 3 }
 0x1ae   : > { %p1511_p9 = scmp.eq.s32.totalorder %s1508_s19, 0 }
 0x1af   : > { %s2371_s20 = sshrl.u32 (!%p1511_p9), %s2466_s27, 3 }
 0x1b0   : > { %1231 = sbr.rel (%p1511_p9) target bundleno = 470 (0x1d6), region = 80  ;;  %p1512_p10 = scmp.le.s32.totalorder (!%p1511_p9), %s2371_s20, 0 }
 0x1b5   : > { %1414 = sbr.rel (%p1512_p10) target bundleno = 453 (0x1c5), region = 156  ;;  %s2458_s28 = smov (!%p1512_p10), %s2365_s18 }
 0x1b6   : > { %s2459_s16 = smov (!%p1512_p10), %s2164_s24  ;;  %s2380_s21 = smov (!%p1512_p10), 0  }
 0x1b7   : > { %s2382_s22 = smov (!%p1512_p10), 0  }
 0x1ba LB: >> { %v1308_v48 = vld [vmem:[%s1792_s16] sm:$0xff]  ;;  %v1310_v60 = vld [vmem:[%s1792_s16 + $0x8] sm:$0xff]  ;;  %v1312_v61 = vld [vmem:[%s1792_s16 + $0x10] sm:$0xff]  ;;  %s1324_s23 = sadd.s32 1, %s1796_s21  ;;  %s1302_s22 = sadd.s32 1, %s1800_s22   ;;  %s1800_s22 = sphi %s2382_s22, %s1302_s22   ;;  %s1796_s21 = sphi %s2380_s21, %s2461_s21   ;;  %s1792_s16 = sphi %s2459_s16, %s1329_s16   ;;  %s1788_s28 = sphi %s2458_s28, %s2460_s28  }
 0x1bb   : >> { %1309 = vst [vmem:[%s1788_s28] sm:$0xff] %v1308_v48  ;;  %v1314_v62 = vld [vmem:[%s1792_s16 + $0x18] sm:$0xff]  ;;  %p1325_p11 = scmp.ge.s32.totalorder %s1324_s23, %s2371_s20  ;;  %v1316_v63 = vld [vmem:[%s1792_s16 + $0x20] sm:$0xff]  ;;  %v1318_v50 = vld [vmem:[%s1792_s16 + $0x28] sm:$0xff]  ;;  %p1301_p12 = scmp.ge.s32.totalorder %s1302_s22, %s2371_s20 }
 0x1bc   : >> { %1311 = vst [vmem:[%s1788_s28 + $0x8] sm:$0xff] %v1310_v60  ;;  %v1320_v11 = vld [vmem:[%s1792_s16 + $0x30] sm:$0xff]  ;;  %v1322_v0 = vld [vmem:[%s1792_s16 + $0x38] sm:$0xff] }
 0x1bd   : >> { %1313 = vst [vmem:[%s1788_s28 + $0x10] sm:$0xff] %v1312_v61  ;;  %s2468_s23 = smov (%p1325_p11, %s1324_s23), 0 }
 0x1be   : >> { %1315 = vst [vmem:[%s1788_s28 + $0x18] sm:$0xff] %v1314_v62  ;;  %s1513_s25 = sshll.u32 %s2468_s23, 6  ;;  %s2461_s21 = smov %s2468_s23 }
 0x1bf   : >> { %1317 = vst [vmem:[%s1788_s28 + $0x20] sm:$0xff] %v1316_v63  ;;  %s1329_s16 = scalar_lea.vmem %s2164_s24, %s1513_s25 [#allocation2]   ;;  %s1330_s30 = scalar_lea.vmem %s2365_s18, %s1513_s25  }
 0x1c0   : >> { %1319 = vst [vmem:[%s1788_s28 + $0x28] sm:$0xff] %v1318_v50  ;;  %1304 = sbr.rel (!%p1301_p12) target bundleno = 442 (0x1ba), region = 162 }
 0x1c1   : >> { %1321 = vst [vmem:[%s1788_s28 + $0x30] sm:$0xff] %v1320_v11 }
 0x1c2   : >> { %1323 = vst [vmem:[%s1788_s28 + $0x38] sm:$0xff] %v1322_v0  ;;  %s2460_s28 = smov %s1330_s30 }
 0x1c5 PF: > { %s2401_s14 = sand.u32 7, %s2466_s27   ;;  %s1524_s17 = sshll.u32 %s2371_s20, 6 }
 0x1c6   : > { %s1335_s19 = scalar_lea.vmem %s2164_s24, %s1524_s17 [#allocation2]   ;;  %s1337_s25 = scalar_lea.vmem %s2365_s18, %s1524_s17  }
 0x1c7   : > { %p1518_p13 = scmp.le.s32.totalorder %s2401_s14, 0 }
 0x1c8   : > { %s1802_s30 = smov (!%p1518_p13), %s1337_s25   ;;  %s1806_s0 = smov (!%p1518_p13), %s1335_s19  }
 0x1c9   : > { %1428 = sbr.rel (%p1518_p13) target bundleno = 470 (0x1d6), region = 167  ;;  %s1810_s1 = smov (!%p1518_p13), 0  }
 0x1ca   : > { %s1814_s23 = smov (!%p1518_p13), 0  }
 0x1ce LB: >> { %v1347_v1 = vld [vmem:[%s1808_s0] sm:$0xff]  ;;  %s1349_s27 = sadd.s32 1, %s1812_s1  ;;  %s1341_s23 = sadd.s32 1, %s1816_s23   ;;  %s1816_s23 = sphi %s1814_s23, %s1341_s23   ;;  %s1812_s1 = sphi %s1810_s1, %s1811_s1   ;;  %s1808_s0 = sphi %s1806_s0, %s1354_s0   ;;  %s1804_s30 = sphi %s1802_s30, %s1355_s30  }
 0x1cf   : >> { %1348 = vst [vmem:[%s1804_s30] sm:$0xff] %v1347_v1  ;;  %p1350_p0 = scmp.ge.s32.totalorder %s1349_s27, %s2401_s14  ;;  %p1340_p1 = scmp.ge.s32.totalorder %s1341_s23, %s2401_s14 }
 0x1d1   : >> { %s2470_s27 = smov (%p1350_p0, %s1349_s27), 0  ;;  %1343 = sbr.rel (!%p1340_p1) target bundleno = 462 (0x1ce), region = 173 }
 0x1d2   : >> { %s1519_s24 = sshll.u32 %s2470_s27, 3  ;;  %s1811_s1 = smov %s2470_s27  }
 0x1d3   : >> { %s1354_s0 = scalar_lea.vmem %s1335_s19, %s1519_s24 [#allocation2]   ;;  %s1355_s30 = scalar_lea.vmem %s1337_s25, %s1519_s24  }
 0x1d6 PF: > { %p20_p2 = scmp.ge.s32.totalorder %s1903_s29, 6   ;;  %s2462_s25 = smov %s1780_s26 }
 0x1d7   : > { %s2463_s26 = smov %s1911_s15  ;;  %s2464_s27 = smov %s1903_s29 }
 0x1d8   :  { %22 = sbr.rel (!%p20_p2) target bundleno = 5 (0x5), region = 184 }

</bundles_post_ra>
